<compile_context>
chip_gen: v5e
topology: v5e:2x2
jax: 0.10.0
libtpu: 0.0.40
codegen_flags: <defaults>
</compile_context>

<pallas_src>
import functools

import jax
import jax.numpy as jnp
from jax import lax
from jax.experimental import pallas as pl
from jax.experimental.pallas import tpu as pltpu


# Per-input-block VMEM budget: double-buffered ~24 MiB + output block + f32 scratch
# fits every generation (v5e/v6e: 128 MiB physical, v7x: 64 MiB physical).
_BLOCK_BUDGET_BYTES = 12 * 1024 * 1024
# ~0.35 us fixed step cost x ~3.2 TB/s (v7x HBM) ~= 1.1 MB; ~2 MiB/step keeps the
# fixed per-step overhead to a few percent.
_TARGET_STEP_BYTES = 2 * 1024 * 1024
# Raise the scoped-VMEM limit above the 16/32 MiB defaults, below v7x's 64 MiB.
_VMEM_LIMIT_BYTES = 48 * 1024 * 1024


def _concat_pool_kernel(x_ref, o_ref, acc_ref, *, hw_total, mask_tail):
    """One grid step of global max+mean pooling.

    x_ref   : (NB, C_TILE, HW_TILE)  input slab (batch, channels, flattened spatial)
    o_ref   : (NB, 2, C_TILE)        row 0 = channel max, row 1 = channel mean;
                                     resident across the spatial grid axis
    acc_ref : (NB, 2, C_TILE) f32    running max (row 0) / running sum (row 1)
    """
    hi = pl.program_id(2)
    n_hw = pl.num_programs(2)

    # 0 on the "max" row, 1 on the "sum" row of the (NB, 2, C_TILE) accumulator.
    row = lax.broadcasted_iota(jnp.int32, acc_ref.shape, 1)

    @pl.when(hi == 0)
    def _init():
        acc_ref[...] = jnp.where(row == 0, -jnp.inf, 0.0).astype(jnp.float32)

    # Accumulate in float32 (exact for f32 inputs, lossless upcast for bf16/f16).
    x = x_ref[...].astype(jnp.float32)

    if mask_tail:
        # Last spatial block may be padded: neutralize the tail for both reductions.
        hw_tile = x.shape[-1]
        pos = hi * hw_tile + lax.broadcasted_iota(jnp.int32, x.shape, 2)
        valid = pos < hw_total
        x_max = jnp.where(valid, x, -jnp.inf)
        x_sum = jnp.where(valid, x, 0.0)
    else:
        x_max = x
        x_sum = x

    acc_ref[:, 0, :] = jnp.maximum(acc_ref[:, 0, :], jnp.max(x_max, axis=-1))
    acc_ref[:, 1, :] = acc_ref[:, 1, :] + jnp.sum(x_sum, axis=-1)

    @pl.when(hi == n_hw - 1)
    def _finalize():
        inv_hw = jnp.float32(1.0 / hw_total)
        acc = acc_ref[...]
        out = jnp.where(row == 0, acc, acc * inv_hw)   # scale only the mean row
        o_ref[...] = out.astype(o_ref.dtype)           # single lane-dense block store


def _choose_tiles(n, c, hw, dtype):
    """Pick (NB, C_TILE, HW_TILE) against the per-block VMEM budget (all static)."""
    bpe = jnp.dtype(dtype).itemsize

    # Channel tile: keep full C when it still leaves room for >=128 spatial lanes;
    # otherwise tile C in multiples of 128 (aligned sublanes in, lane-dense out).
    if c <= 128 or c * 128 * bpe <= _BLOCK_BUDGET_BYTES:
        c_tile = c
    else:
        c_tile = (_BLOCK_BUDGET_BYTES // (128 * bpe)) // 128 * 128
        c_tile = max(128, min(c_tile, (c // 128) * 128))

    # Spatial tile: full extent if it fits, otherwise a multiple of 128 lanes.
    max_hw = _BLOCK_BUDGET_BYTES // (c_tile * bpe)
    if hw <= max_hw:
        hw_tile = hw
    else:
        hw_tile = max(128, (max_hw // 128) * 128)

    # Batch tile: when a whole image fits in one block, pack several images per grid
    # step (~_TARGET_STEP_BYTES moved per step) but no more, so the pipeline and both
    # TensorCores still get multiple grid steps.
    nb = 1
    if c_tile == c and hw_tile == hw:
        per_image = max(1, c * hw * bpe)
        nb = min(_BLOCK_BUDGET_BYTES // per_image,
                 pl.cdiv(_TARGET_STEP_BYTES, per_image))
        nb = max(1, min(n, nb))
        nb = pl.cdiv(n, pl.cdiv(n, nb))   # even out batch blocks
    return nb, c_tile, hw_tile


def adaptive_concat_pool2d(x, *, tile_override=None):
    """x: (N, C, H, W) -> (N, 2*C, 1, 1); same semantics as AdaptiveConcatPool2d((1,1))."""
    if not jnp.issubdtype(x.dtype, jnp.floating):
        raise TypeError(f"adaptive_concat_pool2d expects a floating dtype, got {x.dtype}")
    n, c, h, w = x.shape
    hw = h * w
    x_flat = x.reshape(n, c, hw)

    if tile_override is not None:
        nb, c_tile, hw_tile = tile_override
    else:
        nb, c_tile, hw_tile = _choose_tiles(n, c, hw, x.dtype)

    grid = (pl.cdiv(n, nb), pl.cdiv(c, c_tile), pl.cdiv(hw, hw_tile))
    mask_tail = (hw % hw_tile) != 0

    kernel = functools.partial(_concat_pool_kernel, hw_total=hw, mask_tail=mask_tail)

    out = pl.pallas_call(
        kernel,
        out_shape=jax.ShapeDtypeStruct((n, 2, c), x.dtype),
        grid_spec=pltpu.PrefetchScalarGridSpec(
            num_scalar_prefetch=0,
            grid=grid,
            in_specs=[pl.BlockSpec((nb, c_tile, hw_tile),
                                   lambda b, ci, hi: (b, ci, hi))],
            out_specs=pl.BlockSpec((nb, 2, c_tile),
                                   lambda b, ci, hi: (b, 0, ci)),
            scratch_shapes=[pltpu.VMEM((nb, 2, c_tile), jnp.float32)],
        ),
        compiler_params=pltpu.CompilerParams(
            dimension_semantics=("parallel", "parallel", "arbitrary"),
            vmem_limit_bytes=_VMEM_LIMIT_BYTES,
        ),
    )(x_flat)

    # (N, 2, C) -> (N, 2*C, 1, 1): channels 0..C-1 are max, C..2C-1 are mean.
    return out.reshape(n, 2 * c, 1, 1)


def _reference(x):
    return jnp.concatenate(
        [jnp.max(x, axis=(2, 3), keepdims=True),
         jnp.mean(x, axis=(2, 3), keepdims=True)],
        axis=1,
    )


if __name__ == "__main__":
    key = jax.random.PRNGKey(0)
    k1, k2 = jax.random.split(key)

    # Small shape implied by the module: (N=2, C=4, H=W=16).
    x = jax.random.normal(k1, (2, 4, 16, 16), dtype=jnp.float32)
    y = adaptive_concat_pool2d(x)
    jax.block_until_ready(y)
    assert y.shape == (2, 8, 1, 1), y.shape
    assert jnp.allclose(y, _reference(x), atol=1e-5, rtol=1e-5), "mismatch vs reference"

    # Exercise the tiled paths (partial batch block, channel tiling, masked spatial
    # tail through the f32 running max/sum accumulator) at a still-small shape.
    x2 = jax.random.normal(k2, (3, 256, 18, 18), dtype=jnp.float32)
    y2 = adaptive_concat_pool2d(x2, tile_override=(2, 128, 128))
    jax.block_until_ready(y2)
    assert y2.shape == (3, 512, 1, 1), y2.shape
    assert jnp.allclose(y2, _reference(x2), atol=1e-5, rtol=1e-5), "mismatch vs reference (tiled)"

    print("KERNEL_OK")
</pallas_src>

<mosaic_0001>
module attributes {stable_mosaic.version = 11 : i64} {
  func.func @_concat_pool_kernel(%arg0: i32, %arg1: i32, %arg2: i32, %arg3: memref<2x4x256xf32, #tpu.memory_space<vmem>>, %arg4: memref<2x2x4xf32, #tpu.memory_space<vmem>>, %arg5: memref<2x2x4xf32, #tpu.memory_space<vmem>>) attributes {dimension_semantics = [#tpu.dimension_semantics<parallel>, #tpu.dimension_semantics<parallel>, #tpu.dimension_semantics<arbitrary>], iteration_bounds = array<i64: 1, 1, 1>, scalar_prefetch = 0 : i64, scratch_operands = 1 : i64, tpu.core_type = #tpu.core_type<tc>, window_params = [{transform_indices = @transform_0, window_bounds = array<i64: 2, 4, 256>}, {transform_indices = @transform_1, window_bounds = array<i64: 2, 2, 4>}]} {
    %0 = tpu.iota {dimensions = array<i32: 1>} : vector<2x2x4xi32>
    %c0_i32 = arith.constant 0 : i32
    %1 = arith.cmpi eq, %arg2, %c0_i32 : i32
    %2 = arith.extui %1 : i1 to i32
    %c0_i32_0 = arith.constant 0 : i32
    %3 = arith.cmpi ne, %2, %c0_i32_0 : i32
    scf.if %3 {
      %c0_i32_17 = arith.constant 0 : i32
      %22 = vector.broadcast %c0_i32_17 : i32 to vector<2x2x4xi32>
      %23 = arith.cmpi eq, %0, %22 : vector<2x2x4xi32>
      %cst_18 = arith.constant 0xFF800000 : f32
      %cst_19 = arith.constant 0.000000e+00 : f32
      %24 = vector.broadcast %cst_18 : f32 to vector<2x2x4xf32>
      %25 = vector.broadcast %cst_19 : f32 to vector<2x2x4xf32>
      %26 = arith.select %23, %24, %25 : vector<2x2x4xi1>, vector<2x2x4xf32>
      %c0_20 = arith.constant 0 : index
      %c0_21 = arith.constant 0 : index
      %c0_22 = arith.constant 0 : index
      %27 = vector.load %arg5[%c0_20, %c0_21, %c0_22] : memref<2x2x4xf32, #tpu.memory_space<vmem>>, vector<2x2x4xf32>
      tpu.vector_store %arg5[%c0_20, %c0_21, %c0_22], %26 {strides = array<i32>} : memref<2x2x4xf32, #tpu.memory_space<vmem>>, vector<2x2x4xf32>,
    } else {
    }
    %c0 = arith.constant 0 : index
    %c0_1 = arith.constant 0 : index
    %c0_2 = arith.constant 0 : index
    %4 = vector.load %arg3[%c0, %c0_1, %c0_2] : memref<2x4x256xf32, #tpu.memory_space<vmem>>, vector<2x4x256xf32>
    %c0_3 = arith.constant 0 : index
    %c0_4 = arith.constant 0 : index
    %c0_5 = arith.constant 0 : index
    %5 = vector.load %arg5[%c0_3, %c0_4, %c0_5] : memref<2x2x4xf32, #tpu.memory_space<vmem>>, vector<2x1x4xf32>
    %6 = vector.shape_cast %5 : vector<2x1x4xf32> to vector<2x4xf32>
    %cst = arith.constant dense<0xFF800000> : vector<2x4xf32>
    %7 = vector.multi_reduction <maximumf>, %4, %cst [2] : vector<2x4x256xf32> to vector<2x4xf32>
    %8 = arith.maximumf %6, %7 : vector<2x4xf32>
    %c0_6 = arith.constant 0 : index
    %c0_7 = arith.constant 0 : index
    %c0_8 = arith.constant 0 : index
    %9 = vector.load %arg5[%c0_6, %c0_7, %c0_8] : memref<2x2x4xf32, #tpu.memory_space<vmem>>, vector<2x1x4xf32>
    %10 = vector.shape_cast %9 : vector<2x1x4xf32> to vector<2x4xf32>
    %11 = vector.shape_cast %8 : vector<2x4xf32> to vector<2x1x4xf32>
    tpu.vector_store %arg5[%c0_6, %c0_7, %c0_8], %11 {strides = array<i32>} : memref<2x2x4xf32, #tpu.memory_space<vmem>>, vector<2x1x4xf32>,
    %c0_9 = arith.constant 0 : index
    %c1 = arith.constant 1 : index
    %c0_10 = arith.constant 0 : index
    %12 = vector.load %arg5[%c0_9, %c1, %c0_10] : memref<2x2x4xf32, #tpu.memory_space<vmem>>, vector<2x1x4xf32>
    %13 = vector.shape_cast %12 : vector<2x1x4xf32> to vector<2x4xf32>
    %cst_11 = arith.constant dense<0.000000e+00> : vector<2x4xf32>
    %14 = vector.multi_reduction <add>, %4, %cst_11 [2] : vector<2x4x256xf32> to vector<2x4xf32>
    %15 = arith.addf %13, %14 : vector<2x4xf32>
    %c0_12 = arith.constant 0 : index
    %c1_13 = arith.constant 1 : index
    %c0_14 = arith.constant 0 : index
    %16 = vector.load %arg5[%c0_12, %c1_13, %c0_14] : memref<2x2x4xf32, #tpu.memory_space<vmem>>, vector<2x1x4xf32>
    %17 = vector.shape_cast %16 : vector<2x1x4xf32> to vector<2x4xf32>
    %18 = vector.shape_cast %15 : vector<2x4xf32> to vector<2x1x4xf32>
    tpu.vector_store %arg5[%c0_12, %c1_13, %c0_14], %18 {strides = array<i32>} : memref<2x2x4xf32, #tpu.memory_space<vmem>>, vector<2x1x4xf32>,
    %c0_i32_15 = arith.constant 0 : i32
    %19 = arith.cmpi eq, %arg2, %c0_i32_15 : i32
    %20 = arith.extui %19 : i1 to i32
    %c0_i32_16 = arith.constant 0 : i32
    %21 = arith.cmpi ne, %20, %c0_i32_16 : i32
    scf.if %21 {
      %c0_17 = arith.constant 0 : index
      %c0_18 = arith.constant 0 : index
      %c0_19 = arith.constant 0 : index
      %22 = vector.load %arg5[%c0_17, %c0_18, %c0_19] : memref<2x2x4xf32, #tpu.memory_space<vmem>>, vector<2x2x4xf32>
      %c0_i32_20 = arith.constant 0 : i32
      %23 = vector.broadcast %c0_i32_20 : i32 to vector<2x2x4xi32>
      %24 = arith.cmpi eq, %0, %23 : vector<2x2x4xi32>
      %cst_21 = arith.constant 3.906250e-03 : f32
      %25 = vector.broadcast %cst_21 : f32 to vector<2x2x4xf32>
      %26 = arith.mulf %22, %25 : vector<2x2x4xf32>
      %27 = arith.select %24, %22, %26 : vector<2x2x4xi1>, vector<2x2x4xf32>
      %c0_22 = arith.constant 0 : index
      %c0_23 = arith.constant 0 : index
      %c0_24 = arith.constant 0 : index
      %28 = vector.load %arg4[%c0_22, %c0_23, %c0_24] : memref<2x2x4xf32, #tpu.memory_space<vmem>>, vector<2x2x4xf32>
      tpu.vector_store %arg4[%c0_22, %c0_23, %c0_24], %27 {strides = array<i32>} : memref<2x2x4xf32, #tpu.memory_space<vmem>>, vector<2x2x4xf32>,
    } else {
    }
    return
  }
  func.func @transform_0(%arg0: i32, %arg1: i32, %arg2: i32) -> (i32, i32, i32) {
    %c0_i32 = arith.constant 0 : i32
    return %arg0, %arg1, %arg2 : i32, i32, i32
  }
  func.func @transform_1(%arg0: i32, %arg1: i32, %arg2: i32) -> (i32, i32, i32) {
    %c0_i32 = arith.constant 0 : i32
    %c0_i32_0 = arith.constant 0 : i32
    return %arg0, %c0_i32, %arg1 : i32, i32, i32
  }
}

</mosaic_0001>

<bundles_post_ra>
// kernel: tpu_custom_call.1
= control target key start
LH: loop header
LB: loop body
LE: loop exit
PB: predicated region body
PF: predicated region fallthrough
CT: control target
= control target key end

     0   :  { %6 = vsyncpa [#allocation4], 0  ;;  %s249_s0 = inlined_call_operand.hbm [shape: f32[2,4,256], index: 0, kind: input, shape index: {}]   ;;  %s250_s1 = inlined_call_operand.hbm [shape: f32[2,2,4], index: 1, kind: output, shape index: {}]  }
   0x1   :  { %7 = vsyncpa [#allocation5], 0  ;;  %s12_s8 = sshll.u32 %s249_s0, 4  ;;  %s201_s9 = smov [#allocation3]   ;;  %s13_s8 = int_to_ptr.hbm [resolvable:$true] %s12_s8 }
   0x2   :  { %s14_s10 = sshll.u32 %s201_s9, 4  ;;  %s202_s11 = smov 128   ;;  %s15_s10 = int_to_ptr.vmem [resolvable:$true] %s14_s10 }
   0x3   :  { %s203_s12 = smov 8  }
   0x4   :  { %20 = dma.hbm_to_vmem [thread:$0]  %s13_s8, 256, %s15_s10, [#allocation4], %s202_s11, %s202_s11, %s203_s12  }
   0x5   :  { %197 = dma.done.wait [#allocation4], 256  }
   0x6   :  { %198 = vsyncadd [#allocation4], 4294967040  ;;  %v25_v0 = vlaneseq  ;;  %v36_v2 = vld [vmem:[#allocation3] sm:$0xff]  ;;  %v37_v3 = vld [vmem:[#allocation3 + $0x8] sm:$0xff]  ;;  %vm33_vm1 = vcmask 25600   ;;  %v204_v4 = vmov 0.0  }
   0x7   :  { %42 = vst [vmem:[#allocation1] ss:$2 sm:$0xff] %v36_v2  ;;  %vm53_vm2 = vcmask 1043456   ;;  %vm74_vm3 = vcmask 24576   ;;  %s205_s0 = smov [#allocation6]   ;;  %s129_s16 = sshll.u32 %s250_s1, 4  ;;  %s130_s16 = int_to_ptr.hbm [resolvable:$true] %s129_s16 }
   0x8   :  { %v221_v1 = vshrl.u32 %v25_v0, 7  ;;  %46 = vst [vmem:[#allocation1 + $0x10] ss:$2 sm:$0xff] %v37_v3  ;;  %v67_v26 = vand.u32 127, %v25_v0  ;;  %s127_s13 = sshll.u32 %s205_s0, 4  ;;  %s206_s17 = smov 32   ;;  %s128_s13 = int_to_ptr.vmem [resolvable:$true] %s127_s13 }
   0x9   :  { %s207_s18 = smov 2  }
   0xa   :  { %vm31_vm0 = vcmp.eq.s32.totalorder %v221_v1, 0 }
   0xb   :  { %v32_v5 = vsel %vm31_vm0, -inf, %v204_v4 }
   0xc   :  { %34 = vst.msk [vmem:[#allocation2] sm:$0x3] %vm33_vm1, %v32_v5 }
   0xd   :  { %35 = vst.msk [vmem:[#allocation2 + $0x2] sm:$0x3] %vm33_vm1, %v32_v5 }
   0xe   :  { %v43_v6 = vld.sshfl [vmem:[#allocation1] sm:$0xff pattern:$0x75316420]  ;;  %v44_v7 = vld.sshfl [vmem:[#allocation1 + $0x8] sm:$0xff pattern:$0x75316420] }
   0xf   :  { %79 = vst [vmem:[#allocation1] ss:$2 sm:$0xff] %v36_v2  ;;  %v54_v8 = vsel %vm53_vm2, %v43_v6, -inf  ;;  %v55_v9 = vsel %vm53_vm2, %v44_v7, -inf }
  0x10   :  { %v56_v10 = vmax.f32 %v54_v8, %v55_v9  ;;  %v47_v11 = vld.sshfl [vmem:[#allocation1 + $0x10] sm:$0xff pattern:$0x75316420]  ;;  %v48_v12 = vld.sshfl [vmem:[#allocation1 + $0x18] sm:$0xff pattern:$0x75316420] }
  0x11   :  { %83 = vst [vmem:[#allocation1 + $0x10] ss:$2 sm:$0xff] %v37_v3  ;;  %v59_v13 = vsel %vm53_vm2, %v47_v11, -inf  ;;  %v60_v14 = vsel %vm53_vm2, %v48_v12, -inf }
  0x12   :  { %57 = vmax.xlane.f32.xlu0 %v56_v10  ;;  %v61_v17 = vmax.f32 %v59_v13, %v60_v14 }
  0x13   :  { %v38_v28 = vld [vmem:[#allocation2] sm:$0x1]  ;;  %v77_v32 = vld [vmem:[#allocation2 + $0x1] sm:$0x1] }
  0x14   :  { %v39_v34 = vld [vmem:[#allocation2 + $0x2] sm:$0x1]  ;;  %v78_v40 = vld [vmem:[#allocation2 + $0x3] sm:$0x1] }
  0x16   :  { %v80_v15 = vld.sshfl [vmem:[#allocation1] sm:$0xff pattern:$0x75316420]  ;;  %v81_v16 = vld.sshfl [vmem:[#allocation1 + $0x8] sm:$0xff pattern:$0x75316420] }
  0x17   :  { %v90_v18 = vsel %vm53_vm2, %v80_v15, 0.0  ;;  %v91_v19 = vsel %vm53_vm2, %v81_v16, 0.0 }
  0x18   :  { %v92_v20 = vadd.f32 %v91_v19, %v90_v18  ;;  %v84_v21 = vld.sshfl [vmem:[#allocation1 + $0x10] sm:$0xff pattern:$0x75316420]  ;;  %v85_v22 = vld.sshfl [vmem:[#allocation1 + $0x18] sm:$0xff pattern:$0x75316420] }
  0x19   :  { %v95_v23 = vsel %vm53_vm2, %v84_v21, 0.0  ;;  %v96_v24 = vsel %vm53_vm2, %v85_v22, 0.0 }
  0x1a   :  { %93 = vadd.xlane.f32.xlu1 %v92_v20  ;;  %62 = vmax.xlane.f32.xlu0 %v61_v17  ;;  %v97_v25 = vadd.f32 %v96_v24, %v95_v23 }
  0x22   :  { %98 = vadd.xlane.f32.xlu1 %v97_v25 }
  0x85   :  { %v58_v27 = vpop.xlane.xlu0 %57 }
  0x86   :  { %v68_v29 = vperm.slane %v58_v27, %v67_v26 }
  0x88   :  { %v72_v30 = vmax.f32 %v38_v28, %v68_v29 }
  0x8a   :  { %75 = vst.msk [vmem:[#allocation2] sm:$0x1] %vm74_vm3, %v72_v30 }
  0x8d   :  { %v94_v31 = vpop.xlane.xlu1 %93  ;;  %v63_v33 = vpop.xlane.xlu0 %62 }
  0x8e   :  { %v102_v35 = vperm.slane %v94_v31, %v67_v26  ;;  %v69_v36 = vperm.slane %v63_v33, %v67_v26 }
  0x90   :  { %v106_v37 = vadd.f32 %v102_v35, %v77_v32  ;;  %v73_v38 = vmax.f32 %v39_v34, %v69_v36 }
  0x92   :  { %108 = vst.msk [vmem:[#allocation2 + $0x1] sm:$0x1] %vm74_vm3, %v106_v37 }
  0x93   :  { %76 = vst.msk [vmem:[#allocation2 + $0x2] sm:$0x1] %vm74_vm3, %v73_v38 }
  0x95   :  { %v99_v39 = vpop.xlane.xlu1 %98 }
  0x96   :  { %v103_v41 = vperm.slane %v99_v39, %v67_v26 }
  0x98   :  { %v107_v42 = vadd.f32 %v103_v41, %v78_v40 }
  0x99   :  { %v113_v43 = vld [vmem:[#allocation2] sm:$0x3] }
  0x9a   :  { %109 = vst.msk [vmem:[#allocation2 + $0x3] sm:$0x1] %vm74_vm3, %v107_v42  ;;  %v116_v44 = vmul.f32 0.00390625, %v113_v43 }
  0x9c   :  { %v118_v45 = vsel %vm31_vm0, %v113_v43, %v116_v44 }
  0x9d   :  { %121 = vst.msk [vmem:[#allocation6] sm:$0x3] %vm33_vm1, %v118_v45 }
  0xa1   :  { %v114_v46 = vld [vmem:[#allocation2 + $0x2] sm:$0x3] }
  0xa2   :  { %v117_v47 = vmul.f32 0.00390625, %v114_v46 }
  0xa4   :  { %v119_v48 = vsel %vm31_vm0, %v114_v46, %v117_v47 }
  0xa5   :  { %122 = vst.msk [vmem:[#allocation6 + $0x2] sm:$0x3] %vm33_vm1, %v119_v48 }
  0xa6   :  { %135 = dma.vmem_to_hbm [thread:$0]  %s128_s13, 64, %s130_s16, [#allocation5], %s206_s17, %s206_s17, %s207_s18  }
  0xa7   :  { %199 = dma.done.wait [#allocation5], 64  }
  0xa8   :  { %200 = vsyncadd [#allocation5], 4294967232 }
  0xa9   :  { %140 = vsyncpa [#allocation4], 1 }
  0xaa   :  { %141 = vsyncpa [#allocation5], 1 }

</bundles_post_ra>
